<compile_context>
chip_gen: v7x
topology: tpu7x:2x2x1
jax: 0.10.0
libtpu: 0.0.40
codegen_flags: <defaults>
</compile_context>

<pallas_src>
import functools

import jax
import jax.numpy as jnp
from jax.experimental import pallas as pl
from jax.experimental.pallas import tpu as pltpu

_HIDDEN = (64, 64, 8, 64, 64)   # interior layer widths of the autoencoder
_HPAD = 128                     # lane-dense padded hidden width


def _round_up(x, m):
    return ((x + m - 1) // m) * m


def _mlp_kernel(x_ref, w0_ref, wm_ref, wl_ref, bm_ref, bl_ref, o_ref, *, n_mid):
    """Fused 6-layer forward pass for one batch tile.

    x_ref : (tile, D)        f32   input tile (feature dim unpadded)
    w0_ref: (D, H)           bf16  layer-0 weight (output width padded to H)
    wm_ref: (n_mid, H, H)    bf16  interior weights (zero-padded to HxH)
    wl_ref: (H, D)           bf16  last-layer weight (input width padded to H)
    bm_ref: (n_mid + 1, 1, H) f32  biases of layers 0..n_mid (padded to H)
    bl_ref: (1, D)           f32   last-layer bias
    o_ref : (tile, D)        f32   output tile
    """
    # Layer 0: bf16 MXU operands, f32 accumulation, f32 bias + ReLU.
    h = jnp.dot(x_ref[...].astype(jnp.bfloat16), w0_ref[...],
                preferred_element_type=jnp.float32)
    h = jnp.maximum(h + bm_ref[0], 0.0)

    # Interior layers 1..n_mid (static unroll, 4 layers).
    for i in range(n_mid):
        h = jnp.dot(h.astype(jnp.bfloat16), wm_ref[i],
                    preferred_element_type=jnp.float32)
        h = jnp.maximum(h + bm_ref[i + 1], 0.0)

    # Last layer: no ReLU.
    y = jnp.dot(h.astype(jnp.bfloat16), wl_ref[...],
                preferred_element_type=jnp.float32) + bl_ref[...]
    o_ref[...] = y.astype(o_ref.dtype)


def pack_params(params, *, hidden_pad=_HPAD, mxu_dtype=jnp.bfloat16):
    """Pack the 6 (W (in,out), b (out,)) pairs into 5 dense arrays.

    Call ONCE at init time (outside the per-forward path).
    """
    assert len(params) >= 3
    H = hidden_pad
    w0, b0 = params[0]
    wl, bl = params[-1]
    mids = params[1:-1]
    d_in, h0 = w0.shape
    hl, d_out = wl.shape
    assert h0 <= H and hl <= H

    w0_p = jnp.zeros((d_in, H), mxu_dtype).at[:, :h0].set(w0.astype(mxu_dtype))
    wm_p = jnp.zeros((len(mids), H, H), mxu_dtype)
    bm_p = jnp.zeros((len(mids) + 1, 1, H), jnp.float32)
    bm_p = bm_p.at[0, 0, :b0.shape[0]].set(b0.astype(jnp.float32))
    for i, (w, b) in enumerate(mids):
        fi, fo = w.shape
        assert fi <= H and fo <= H
        wm_p = wm_p.at[i, :fi, :fo].set(w.astype(mxu_dtype))
        bm_p = bm_p.at[i + 1, 0, :fo].set(b.astype(jnp.float32))
    wl_p = jnp.zeros((H, d_out), mxu_dtype).at[:hl, :].set(wl.astype(mxu_dtype))
    bl_p = bl.reshape(1, d_out).astype(jnp.float32)
    return w0_p, wm_p, wl_p, bm_p, bl_p


def mlp_forward(x, packed, *, batch_tile=1024):
    """x: (B, dim_input) float32. packed: output of pack_params."""
    w0_p, wm_p, wl_p, bm_p, bl_p = packed
    B, D = x.shape
    H = w0_p.shape[1]
    n_mid = wm_p.shape[0]
    assert w0_p.shape[0] == D and wl_p.shape[1] == D

    # Batch tile: multiple of 8 (sublane), never larger than the (8-rounded)
    # batch, and capped at ~half the batch so the grid has >=2 parallel steps
    # (keeps both v7x TensorCores busy). Ragged edges are masked by Pallas.
    b8 = _round_up(B, 8)
    tile = min(_round_up(batch_tile, 8), b8)
    if b8 >= 16:
        tile = min(tile, _round_up((b8 + 1) // 2, 8))
    grid = (pl.cdiv(B, tile),)

    kernel = functools.partial(_mlp_kernel, n_mid=n_mid)

    return pl.pallas_call(
        kernel,
        out_shape=jax.ShapeDtypeStruct((B, D), x.dtype),
        grid_spec=pltpu.PrefetchScalarGridSpec(
            num_scalar_prefetch=0,
            grid=grid,
            in_specs=[
                pl.BlockSpec((tile, D), lambda i: (i, 0)),             # x tile
                pl.BlockSpec((D, H), lambda i: (0, 0)),                # w0
                pl.BlockSpec((n_mid, H, H), lambda i: (0, 0, 0)),      # w1..w4
                pl.BlockSpec((H, D), lambda i: (0, 0)),                # w5
                pl.BlockSpec((n_mid + 1, 1, H), lambda i: (0, 0, 0)),  # b0..b4
                pl.BlockSpec((1, D), lambda i: (0, 0)),                # b5
            ],
            out_specs=pl.BlockSpec((tile, D), lambda i: (i, 0)),
        ),
        compiler_params=pltpu.CompilerParams(
            dimension_semantics=("parallel",),
            vmem_limit_bytes=32 * 1024 * 1024,
        ),
    )(x, w0_p, wm_p, wl_p, bm_p, bl_p)


def init_params(key, dim_input):
    """Deterministic init matching the module's layer shapes (PyTorch-like)."""
    sizes = [dim_input, *_HIDDEN, dim_input]
    params = []
    for fan_in, fan_out in zip(sizes[:-1], sizes[1:]):
        key, kw, kb = jax.random.split(key, 3)
        bound = 1.0 / jnp.sqrt(fan_in)
        w = jax.random.uniform(kw, (fan_in, fan_out), jnp.float32, -bound, bound)
        b = jax.random.uniform(kb, (fan_out,), jnp.float32, -bound, bound)
        params.append((w, b))
    return params


def reference_forward(x, params):
    h = x
    n = len(params)
    for i, (w, b) in enumerate(params):
        h = h @ w + b
        if i < n - 1:
            h = jnp.maximum(h, 0.0)
    return h


if __name__ == "__main__":
    key = jax.random.PRNGKey(0)
    dim_input = 32
    batch = 16

    key, kx = jax.random.split(key)
    x = jax.random.normal(kx, (batch, dim_input), jnp.float32)
    params = init_params(key, dim_input)

    packed = pack_params(params)          # packed once, outside the forward path
    fwd = jax.jit(mlp_forward)
    out = jax.block_until_ready(fwd(x, packed))

    ref = reference_forward(x, params)
    assert out.shape == (batch, dim_input)
    # bf16 MXU operands with f32 accumulation -> deliberately relaxed tolerance.
    assert jnp.allclose(out, ref, atol=2e-2, rtol=2e-2), "mismatch vs reference"

    print("KERNEL_OK")
</pallas_src>

<mosaic_0001>
module attributes {stable_mosaic.version = 11 : i64} {
  func.func @_mlp_kernel(%arg0: i32, %arg1: memref<8x32xf32, #tpu.memory_space<vmem>>, %arg2: memref<32x128xbf16, #tpu.memory_space<vmem>>, %arg3: memref<4x128x128xbf16, #tpu.memory_space<vmem>>, %arg4: memref<128x32xbf16, #tpu.memory_space<vmem>>, %arg5: memref<5x1x128xf32, #tpu.memory_space<vmem>>, %arg6: memref<1x32xf32, #tpu.memory_space<vmem>>, %arg7: memref<8x32xf32, #tpu.memory_space<vmem>>) attributes {dimension_semantics = [#tpu.dimension_semantics<parallel>], iteration_bounds = array<i64: 2>, scalar_prefetch = 0 : i64, scratch_operands = 0 : i64, tpu.core_type = #tpu.core_type<tc>, window_params = [{transform_indices = @transform_0, window_bounds = array<i64: 8, 32>}, {pipeline_mode = #tpu.pipeline_mode<synchronous>, transform_indices = @transform_1, window_bounds = array<i64: 32, 128>}, {pipeline_mode = #tpu.pipeline_mode<synchronous>, transform_indices = @transform_2, window_bounds = array<i64: 4, 128, 128>}, {pipeline_mode = #tpu.pipeline_mode<synchronous>, transform_indices = @transform_3, window_bounds = array<i64: 128, 32>}, {pipeline_mode = #tpu.pipeline_mode<synchronous>, transform_indices = @transform_4, window_bounds = array<i64: 5, 1, 128>}, {pipeline_mode = #tpu.pipeline_mode<synchronous>, transform_indices = @transform_5, window_bounds = array<i64: 1, 32>}, {transform_indices = @transform_6, window_bounds = array<i64: 8, 32>}]} {
    %c0 = arith.constant 0 : index
    %c0_0 = arith.constant 0 : index
    %0 = vector.load %arg1[%c0, %c0_0] : memref<8x32xf32, #tpu.memory_space<vmem>>, vector<8x32xf32>
    %1 = arith.truncf %0 : vector<8x32xf32> to vector<8x32xbf16>
    %c0_1 = arith.constant 0 : index
    %c0_2 = arith.constant 0 : index
    %2 = vector.load %arg2[%c0_1, %c0_2] : memref<32x128xbf16, #tpu.memory_space<vmem>>, vector<32x128xbf16>
    %cst = arith.constant dense<0.000000e+00> : vector<8x128xf32>
    %3 = tpu.matmul %1, %2, %cst {dimension_numbers = #tpu.dot_dimension_numbers<[1], [0], [0], [1], [0, 0, 1, 1], [], []>} : vector<8x32xbf16>, vector<32x128xbf16>, vector<8x128xf32> -> vector<8x128xf32>
    %c0_3 = arith.constant 0 : index
    %c0_4 = arith.constant 0 : index
    %c0_5 = arith.constant 0 : index
    %4 = vector.load %arg5[%c0_3, %c0_4, %c0_5] : memref<5x1x128xf32, #tpu.memory_space<vmem>>, vector<1x1x128xf32>
    %5 = vector.shape_cast %4 : vector<1x1x128xf32> to vector<1x128xf32>
    %6 = vector.broadcast %5 : vector<1x128xf32> to vector<8x128xf32>
    %7 = arith.addf %3, %6 : vector<8x128xf32>
    %cst_6 = arith.constant 0.000000e+00 : f32
    %8 = vector.broadcast %cst_6 : f32 to vector<8x128xf32>
    %9 = arith.maximumf %7, %8 : vector<8x128xf32>
    %10 = arith.truncf %9 : vector<8x128xf32> to vector<8x128xbf16>
    %c0_7 = arith.constant 0 : index
    %c0_8 = arith.constant 0 : index
    %c0_9 = arith.constant 0 : index
    %11 = vector.load %arg3[%c0_7, %c0_8, %c0_9] : memref<4x128x128xbf16, #tpu.memory_space<vmem>>, vector<1x128x128xbf16>
    %12 = vector.shape_cast %11 : vector<1x128x128xbf16> to vector<128x128xbf16>
    %cst_10 = arith.constant dense<0.000000e+00> : vector<8x128xf32>
    %13 = tpu.matmul %10, %12, %cst_10 {dimension_numbers = #tpu.dot_dimension_numbers<[1], [0], [0], [1], [0, 0, 1, 1], [], []>} : vector<8x128xbf16>, vector<128x128xbf16>, vector<8x128xf32> -> vector<8x128xf32>
    %c1 = arith.constant 1 : index
    %c0_11 = arith.constant 0 : index
    %c0_12 = arith.constant 0 : index
    %14 = vector.load %arg5[%c1, %c0_11, %c0_12] : memref<5x1x128xf32, #tpu.memory_space<vmem>>, vector<1x1x128xf32>
    %15 = vector.shape_cast %14 : vector<1x1x128xf32> to vector<1x128xf32>
    %16 = vector.broadcast %15 : vector<1x128xf32> to vector<8x128xf32>
    %17 = arith.addf %13, %16 : vector<8x128xf32>
    %cst_13 = arith.constant 0.000000e+00 : f32
    %18 = vector.broadcast %cst_13 : f32 to vector<8x128xf32>
    %19 = arith.maximumf %17, %18 : vector<8x128xf32>
    %20 = arith.truncf %19 : vector<8x128xf32> to vector<8x128xbf16>
    %c1_14 = arith.constant 1 : index
    %c0_15 = arith.constant 0 : index
    %c0_16 = arith.constant 0 : index
    %21 = vector.load %arg3[%c1_14, %c0_15, %c0_16] : memref<4x128x128xbf16, #tpu.memory_space<vmem>>, vector<1x128x128xbf16>
    %22 = vector.shape_cast %21 : vector<1x128x128xbf16> to vector<128x128xbf16>
    %cst_17 = arith.constant dense<0.000000e+00> : vector<8x128xf32>
    %23 = tpu.matmul %20, %22, %cst_17 {dimension_numbers = #tpu.dot_dimension_numbers<[1], [0], [0], [1], [0, 0, 1, 1], [], []>} : vector<8x128xbf16>, vector<128x128xbf16>, vector<8x128xf32> -> vector<8x128xf32>
    %c2 = arith.constant 2 : index
    %c0_18 = arith.constant 0 : index
    %c0_19 = arith.constant 0 : index
    %24 = vector.load %arg5[%c2, %c0_18, %c0_19] : memref<5x1x128xf32, #tpu.memory_space<vmem>>, vector<1x1x128xf32>
    %25 = vector.shape_cast %24 : vector<1x1x128xf32> to vector<1x128xf32>
    %26 = vector.broadcast %25 : vector<1x128xf32> to vector<8x128xf32>
    %27 = arith.addf %23, %26 : vector<8x128xf32>
    %cst_20 = arith.constant 0.000000e+00 : f32
    %28 = vector.broadcast %cst_20 : f32 to vector<8x128xf32>
    %29 = arith.maximumf %27, %28 : vector<8x128xf32>
    %30 = arith.truncf %29 : vector<8x128xf32> to vector<8x128xbf16>
    %c2_21 = arith.constant 2 : index
    %c0_22 = arith.constant 0 : index
    %c0_23 = arith.constant 0 : index
    %31 = vector.load %arg3[%c2_21, %c0_22, %c0_23] : memref<4x128x128xbf16, #tpu.memory_space<vmem>>, vector<1x128x128xbf16>
    %32 = vector.shape_cast %31 : vector<1x128x128xbf16> to vector<128x128xbf16>
    %cst_24 = arith.constant dense<0.000000e+00> : vector<8x128xf32>
    %33 = tpu.matmul %30, %32, %cst_24 {dimension_numbers = #tpu.dot_dimension_numbers<[1], [0], [0], [1], [0, 0, 1, 1], [], []>} : vector<8x128xbf16>, vector<128x128xbf16>, vector<8x128xf32> -> vector<8x128xf32>
    %c3 = arith.constant 3 : index
    %c0_25 = arith.constant 0 : index
    %c0_26 = arith.constant 0 : index
    %34 = vector.load %arg5[%c3, %c0_25, %c0_26] : memref<5x1x128xf32, #tpu.memory_space<vmem>>, vector<1x1x128xf32>
    %35 = vector.shape_cast %34 : vector<1x1x128xf32> to vector<1x128xf32>
    %36 = vector.broadcast %35 : vector<1x128xf32> to vector<8x128xf32>
    %37 = arith.addf %33, %36 : vector<8x128xf32>
    %cst_27 = arith.constant 0.000000e+00 : f32
    %38 = vector.broadcast %cst_27 : f32 to vector<8x128xf32>
    %39 = arith.maximumf %37, %38 : vector<8x128xf32>
    %40 = arith.truncf %39 : vector<8x128xf32> to vector<8x128xbf16>
    %c3_28 = arith.constant 3 : index
    %c0_29 = arith.constant 0 : index
    %c0_30 = arith.constant 0 : index
    %41 = vector.load %arg3[%c3_28, %c0_29, %c0_30] : memref<4x128x128xbf16, #tpu.memory_space<vmem>>, vector<1x128x128xbf16>
    %42 = vector.shape_cast %41 : vector<1x128x128xbf16> to vector<128x128xbf16>
    %cst_31 = arith.constant dense<0.000000e+00> : vector<8x128xf32>
    %43 = tpu.matmul %40, %42, %cst_31 {dimension_numbers = #tpu.dot_dimension_numbers<[1], [0], [0], [1], [0, 0, 1, 1], [], []>} : vector<8x128xbf16>, vector<128x128xbf16>, vector<8x128xf32> -> vector<8x128xf32>
    %c4 = arith.constant 4 : index
    %c0_32 = arith.constant 0 : index
    %c0_33 = arith.constant 0 : index
    %44 = vector.load %arg5[%c4, %c0_32, %c0_33] : memref<5x1x128xf32, #tpu.memory_space<vmem>>, vector<1x1x128xf32>
    %45 = vector.shape_cast %44 : vector<1x1x128xf32> to vector<1x128xf32>
    %46 = vector.broadcast %45 : vector<1x128xf32> to vector<8x128xf32>
    %47 = arith.addf %43, %46 : vector<8x128xf32>
    %cst_34 = arith.constant 0.000000e+00 : f32
    %48 = vector.broadcast %cst_34 : f32 to vector<8x128xf32>
    %49 = arith.maximumf %47, %48 : vector<8x128xf32>
    %50 = arith.truncf %49 : vector<8x128xf32> to vector<8x128xbf16>
    %c0_35 = arith.constant 0 : index
    %c0_36 = arith.constant 0 : index
    %51 = vector.load %arg4[%c0_35, %c0_36] : memref<128x32xbf16, #tpu.memory_space<vmem>>, vector<128x32xbf16>
    %cst_37 = arith.constant dense<0.000000e+00> : vector<8x32xf32>
    %52 = tpu.matmul %50, %51, %cst_37 {dimension_numbers = #tpu.dot_dimension_numbers<[1], [0], [0], [1], [0, 0, 1, 1], [], []>} : vector<8x128xbf16>, vector<128x32xbf16>, vector<8x32xf32> -> vector<8x32xf32>
    %c0_38 = arith.constant 0 : index
    %c0_39 = arith.constant 0 : index
    %53 = vector.load %arg6[%c0_38, %c0_39] : memref<1x32xf32, #tpu.memory_space<vmem>>, vector<1x32xf32>
    %54 = vector.broadcast %53 : vector<1x32xf32> to vector<8x32xf32>
    %55 = arith.addf %52, %54 : vector<8x32xf32>
    %c0_40 = arith.constant 0 : index
    %c0_41 = arith.constant 0 : index
    %56 = vector.load %arg7[%c0_40, %c0_41] : memref<8x32xf32, #tpu.memory_space<vmem>>, vector<8x32xf32>
    tpu.vector_store %arg7[%c0_40, %c0_41], %55 {strides = array<i32>} : memref<8x32xf32, #tpu.memory_space<vmem>>, vector<8x32xf32>,
    return
  }
  func.func @transform_0(%arg0: i32) -> (i32, i32) {
    %c0_i32 = arith.constant 0 : i32
    %c0_i32_0 = arith.constant 0 : i32
    return %arg0, %c0_i32 : i32, i32
  }
  func.func @transform_1(%arg0: i32) -> (i32, i32) {
    %c0_i32 = arith.constant 0 : i32
    %c0_i32_0 = arith.constant 0 : i32
    %c0_i32_1 = arith.constant 0 : i32
    return %c0_i32, %c0_i32_0 : i32, i32
  }
  func.func @transform_2(%arg0: i32) -> (i32, i32, i32) {
    %c0_i32 = arith.constant 0 : i32
    %c0_i32_0 = arith.constant 0 : i32
    %c0_i32_1 = arith.constant 0 : i32
    %c0_i32_2 = arith.constant 0 : i32
    return %c0_i32, %c0_i32_0, %c0_i32_1 : i32, i32, i32
  }
  func.func @transform_3(%arg0: i32) -> (i32, i32) {
    %c0_i32 = arith.constant 0 : i32
    %c0_i32_0 = arith.constant 0 : i32
    %c0_i32_1 = arith.constant 0 : i32
    return %c0_i32, %c0_i32_0 : i32, i32
  }
  func.func @transform_4(%arg0: i32) -> (i32, i32, i32) {
    %c0_i32 = arith.constant 0 : i32
    %c0_i32_0 = arith.constant 0 : i32
    %c0_i32_1 = arith.constant 0 : i32
    %c0_i32_2 = arith.constant 0 : i32
    return %c0_i32, %c0_i32_0, %c0_i32_1 : i32, i32, i32
  }
  func.func @transform_5(%arg0: i32) -> (i32, i32) {
    %c0_i32 = arith.constant 0 : i32
    %c0_i32_0 = arith.constant 0 : i32
    %c0_i32_1 = arith.constant 0 : i32
    return %c0_i32, %c0_i32_0 : i32, i32
  }
  func.func @transform_6(%arg0: i32) -> (i32, i32) {
    %c0_i32 = arith.constant 0 : i32
    %c0_i32_0 = arith.constant 0 : i32
    return %arg0, %c0_i32 : i32, i32
  }
}

</mosaic_0001>

<bundles_post_ra>
// kernel: mlp_forward.1
= control target key start
LH: loop header
LB: loop body
LE: loop exit
PB: predicated region body
PF: predicated region fallthrough
CT: control target
= control target key end

     0   :  { %11 = vsyncpa [#allocation3], 0  ;;  %s1683_s0 = inlined_call_operand.vmem [shape: f32[16,32], index: 0, kind: input, shape index: {}]   ;;  %s1684_s1 = inlined_call_operand.vmem [shape: bf16[32,128], index: 1, kind: input, shape index: {}]   ;;  %s1685_s2 = inlined_call_operand.hbm [shape: bf16[4,128,128], index: 2, kind: input, shape index: {}]   ;;  %s1686_s3 = inlined_call_operand.vmem [shape: bf16[128,32], index: 3, kind: input, shape index: {}]   ;;  %s1687_s4 = inlined_call_operand.vmem [shape: f32[5,1,128], index: 4, kind: input, shape index: {}]   ;;  %s1688_s5 = inlined_call_operand.vmem [shape: f32[1,32], index: 5, kind: input, shape index: {}]   ;;  %s1689_s6 = inlined_call_operand.hbm [shape: f32[16,32], index: 6, kind: output, shape index: {}]  }
   0x1   :  { %12 = vsyncpa [#allocation4], 0 }
   0x2   :  { %14 = vsyncpa [#allocation4 + $0x1], 0  ;;  %s1444_s21 = smov 0   ;;  %s1446_s22 = smov 0  }
   0x3   :  { %s1448_s23 = smov 0   ;;  %s1450_s24 = smov 0  }
   0x4 LB: > { %s1465_s25 = sadd.s32 4294967295, %s1401_s24   ;;  %s990_s26 = sadd.s32 4294967294, %s1401_s24   ;;  %s1401_s24 = sphi %s1450_s24, %s1705_s24   ;;  %s1397_s23 = sphi %s1448_s23, %s1704_s23   ;;  %s1393_s22 = sphi %s1446_s22, %s1703_s22   ;;  %s1389_s21 = sphi %s1444_s21, %s1702_s21  }
   0x5   : > { %s1469_s27 = sadd.s32 1, %s1401_s24   ;;  %s158_s28 = sadd.s32 1, %s1397_s23 }
   0x6   : > { %s155_s29 = ssub.s32 %s1401_s24, %s1469_s27  ;;  %p168_p0 = scmp.ne.s32.totalorder %s1397_s23, %s1393_s22 }
   0x7   : > { %p156_p1 = scmp.eq.s32.totalorder %s155_s29, 0  ;;  %p169_p2 = scmp.eq.s32.totalorder %s1465_s25, 1 }
   0x8   : > { %p174_p3 = scmp.ne.s32.totalorder %s1393_s22, %s1389_s21  ;;  %p175_p4 = scmp.eq.s32.totalorder %s990_s26, 1 }
   0x9   : > { %s1480_s30 = scalar_select %p156_p1, %s1397_s23, %s158_s28  }
   0xa   : > { %p1482_p5 = por %p169_p2, %p168_p0  ;;  %p1486_p6 = por %p175_p4, %p174_p3 }
   0xb   : > { %p991_p7 = scmp.ge.s32.totalorder %s1401_s24, 1  ;;  %p182_p8 = scmp.lt.s32.totalorder %s1401_s24, 3 }
   0xc   : > { %s1693_s7 = scalar_select %p1482_p5, 1, 0 }
   0xd   : > { %s1694_s8 = scalar_select %p1486_p6, 1, 0 }
   0xe   : > { %p1690_p9 = scmp.eq.s32.totalorder %s1465_s25, 0  ;;  %p1493_p10 = pnand %p991_p7, %p182_p8 }
   0xf   : > { %s1403_s10 = smov [#allocation2]   ;;  %s1307_s15 = scalar_lea.hbm %s1685_s2, 4096 }
  0x10   : > { %s1695_s9 = scalar_select %p1493_p10, 1, 0 }
  0x11   : > { %s197_s11 = sshll.u32 %s1403_s10, 4  ;;  %p1217_p11 = pneg %p1493_p10  ;;  %s198_s11 = int_to_ptr.vmem [resolvable:$true] %s197_s11 }
  0x12   : > { %p1308_p13 = scmp.ne.s32.totalorder %s1685_s2, %s1307_s15  ;;  %p1314_p3 = scmp.lt.u32.totalorder %s1307_s15, %s1685_s2 }
  0x13   : > { %p1501_p12 = pnand %p1690_p9, %p1217_p11 }
  0x15   : > { %p1309_p0 = pneg %p1501_p12 }
  0x17   : > { %p1310_p1 = pnand %p1309_p0, %p1308_p13 }
  0x19   : > { %p1311_p2 = pneg %p1310_p1 }
  0x1b   : > { %p1316_p4 = pnand %p1314_p3, %p1311_p2 }
  0x1d   : > { %1319 = shalt.err (!%p1316_p4)
}
  0x1e   : > { %s1320_s20 = scalar_lea.vmem %s198_s11, 4096  ;;  %p1328_p9 = scmp.lt.s32.totalorder %s198_s11, %s198_s11 }
  0x1f   : > { %p1321_p7 = scmp.ne.s32.totalorder %s198_s11, %s1320_s20  ;;  %p1329_p6 = scmp.lt.s32.totalorder %s1320_s20, %s1320_s20 }
  0x21   : > { %p1323_p8 = pnand %p1321_p7, %p1309_p0  ;;  %p1330_p5 = por %p1329_p6, %p1328_p9 }
  0x23   : > { %p1324_p11 = pneg %p1323_p8 }
  0x25   : > { %p1331_p10 = pnand %p1330_p5, %p1324_p11 }
  0x27   : > { %1334 = shalt.err (!%p1331_p10)
}
  0x28   : > { %s1404_s26 = smov 64   ;;  %s1405_s28 = smov 4  }
  0x29   : > { %1220 = dma.hbm_to_vmem [thread:$0]  (!%p1501_p12), %s1685_s2, 4096, %s198_s11, [#allocation3], %s1404_s26, %s1404_s26, %s1405_s28  }
  0x2a   : > { %p1697_p13 = scmp.ne.s32.totalorder %s1695_s9, 0 }
  0x2b   : > { %p1698_p1 = scmp.eq.s32.totalorder (!%p1697_p13), %s1465_s25, 0 }
  0x2c   : > { %229 = sbr.rel (%p1697_p13) target bundleno = 1380 (0x564), region = 44 }
  0x33   : > { %1380 = dma.done.wait (%p1698_p1), [#allocation3], 4096   ;;  %p1699_p0 = pmov %p1698_p1 }
  0x34   : > { %p258_p5 = scmp.lt.s32.totalorder %s1465_s25, 1  ;;  %v1406_v0 = vmov 0.0   ;;  %vm1407_vm0 = vmmov 0   ;;  %v1265_v1 = vld [vmem:[%s1684_s1] sm:$0xff]   ;;  %v1266_v2 = vld [vmem:[%s1684_s1 + $0x8] sm:$0xff]   ;;  %vm288_vm1 = vcmask 261120  }
  0x35   : > { %1382 = vsyncadd (%p1699_p0), [#allocation3], 4294963200  ;;  %1103 = vmatprep.subr.bf16.mxu0 %v1406_v0  ;;  %1107 = vmatprep.mubr.msk.bf16.mxu0 %vm1407_vm0, %v1406_v0  ;;  %v1267_v4 = vld [vmem:[#allocation2] sm:$0xff]   ;;  %v1268_v6 = vld [vmem:[#allocation2 + $0x8] sm:$0xff]   ;;  %s255_s15 = sand.u32 1, %s1393_s22   ;;  %s1052_s19 = sshll.u32 %s1465_s25, 7 }
  0x36   : > { %s259_s11 = scalar_select %p258_p5, %s1465_s25, 1  ;;  %1111 = vmatprep.subr.bf16.mxu1 %v1406_v0  ;;  %1127 = vmatprep.mubr.msk.bf16.mxu1 %vm1407_vm0, %v1406_v0  ;;  %v1269_v7 = vld [vmem:[#allocation2 + $0x10] sm:$0xff]   ;;  %v1270_v8 = vld [vmem:[#allocation2 + $0x18] sm:$0xff]   ;;  %v1271_v9 = vld [vmem:[#allocation2 + $0x20] sm:$0xff]  }
  0x37   : > { %1104 = vmatpush3.bf16.msra.mxu0 %v1265_v1  ;;  %1112 = vmatpush3.bf16.msra.mxu1 %v1267_v4  ;;  %v1272_v10 = vld [vmem:[#allocation2 + $0x28] sm:$0xff]   ;;  %v1273_v11 = vld [vmem:[#allocation2 + $0x30] sm:$0xff]   ;;  %v1274_v12 = vld [vmem:[#allocation2 + $0x38] sm:$0xff]   ;;  %s996_s16 = sshll.u32 %s255_s15, 3  ;;  %s1640_s10 = scalar_lea.hbm %s1689_s6, %s1052_s19 }
  0x38   : > { %s997_s9 = sshll.u32 %s259_s11, 3  ;;  %1105 = vmatprep.subr.bf16.mxu0 %v1406_v0  ;;  %1113 = vmatprep.subr.bf16.mxu1 %v1406_v0  ;;  %v1275_v13 = vld [vmem:[#allocation2 + $0x40] sm:$0xff]   ;;  %v1276_v14 = vld [vmem:[#allocation2 + $0x48] sm:$0xff]   ;;  %v1277_v15 = vld [vmem:[#allocation2 + $0x50] sm:$0xff]   ;;  %s257_s20 = scalar_lea.vmem [#allocation5], %s996_s16 }
  0x39   : > { %s261_s14 = scalar_lea.vmem %s1683_s0, %s997_s9  ;;  %v1278_v16 = vld [vmem:[#allocation2 + $0x58] sm:$0xff]   ;;  %v1279_v17 = vld [vmem:[#allocation2 + $0x60] sm:$0xff]   ;;  %v1280_v18 = vld [vmem:[#allocation2 + $0x68] sm:$0xff]   ;;  %s919_s26 = sshll.u32 %s257_s20, 4  ;;  %s1642_s26 = int_to_ptr.vmem [resolvable:$true] %s919_s26 }
  0x3a   : > { %v263_v3 = vld [vmem:[%s261_s14] sm:$0xff]  ;;  %v1281_v27 = vld [vmem:[#allocation2 + $0x70] sm:$0xff]   ;;  %v1282_v28 = vld [vmem:[#allocation2 + $0x78] sm:$0xff]   ;;  %s906_s25 = scalar_lea.sflag [#allocation4], %s255_s15  ;;  %s1335_s11 = scalar_lea.vmem %s1642_s26, 128 }
  0x3b   : > { %v264_v5 = vpack.c.bf16 %v263_v3, %v263_v3  ;;  %1106 = vmatpush3.bf16.msra.mxu0 %v1266_v2  ;;  %1114 = vmatpush3.bf16.msra.mxu1 %v1268_v6  ;;  %v998_v19 = vld [vmem:[%s1687_s4] ss:$0 sm:$0xff]  ;;  %v1284_v30 = vld [vmem:[#allocation2 + $0x88] sm:$0xff]   ;;  %v1285_v31 = vld [vmem:[#allocation2 + $0x90] sm:$0xff]   ;;  %p1336_p6 = scmp.ne.s32.totalorder %s1642_s26, %s1335_s11  ;;  %p1700_p9 = scmp.ne.s32.totalorder %s1693_s7, 0 }
  0x3c   : > { %1131 = vmatprep.subr.bf16.mxu0 %v1406_v0  ;;  %1115 = vmatprep.subr.bf16.mxu1 %v1406_v0  ;;  %v1283_v29 = vld [vmem:[#allocation2 + $0x80] sm:$0xff]   ;;  %v1286_v32 = vld [vmem:[#allocation2 + $0x98] sm:$0xff]   ;;  %v1288_v34 = vld [vmem:[#allocation2 + $0xa8] sm:$0xff]   ;;  %s1408_s9 = smov [#allocation5]  }
  0x3d   : > { %v1287_v33 = vld [vmem:[#allocation2 + $0xa0] sm:$0xff]   ;;  %v1289_v43 = vld [vmem:[#allocation2 + $0xb0] sm:$0xff]   ;;  %v1290_v44 = vld [vmem:[#allocation2 + $0xb8] sm:$0xff]   ;;  %p1337_p10 = pnand %p1336_p6, %p1700_p9  ;;  %s1339_s12 = sshll.u32 %s1408_s9, 4  ;;  %s1340_s12 = int_to_ptr.vmem [resolvable:$false] %s1339_s12 }
  0x3e   : > { %1108 = vmatmul.mubr.msk.bf16.vlgmr.msra.gmra.mrb[0].mxu0 %vm288_vm1, %v264_v5  ;;  %v1003_v35 = vld [vmem:[%s1687_s4 + $0x1] ss:$0 sm:$0xff]  ;;  %v1292_v46 = vld [vmem:[#allocation2 + $0xc8] sm:$0xff]   ;;  %v1293_v47 = vld [vmem:[#allocation2 + $0xd0] sm:$0xff]   ;;  %s1341_s13 = scalar_lea.vmem %s1340_s12, 256  ;;  %p1342_p2 = scmp.lt.s32.totalorder %s1642_s26, %s1340_s12 }
  0x3f   : > { %1147 = vmatprep.mubr.msk.bf16.mxu0 %vm1407_vm0, %v1406_v0  ;;  %1116 = vmatpush3.bf16.msra.mxu1 %v1269_v7  ;;  %v1291_v45 = vld [vmem:[#allocation2 + $0xc0] sm:$0xff]   ;;  %v1294_v48 = vld [vmem:[#allocation2 + $0xd8] sm:$0xff]   ;;  %v1296_v50 = vld [vmem:[#allocation2 + $0xe8] sm:$0xff]   ;;  %p1338_p12 = pneg %p1337_p10  ;;  %p1343_p3 = scmp.lt.s32.totalorder %s1341_s13, %s1335_s11 }
  0x40   : > { %1117 = vmatprep.subr.bf16.mxu1 %v1406_v0  ;;  %1132 = vmatpush3.bf16.msra.mxu0 %v1275_v13  ;;  %v1295_v49 = vld [vmem:[#allocation2 + $0xe0] sm:$0xff]   ;;  %v1297_v59 = vld [vmem:[#allocation2 + $0xf0] sm:$0xff]   ;;  %v1298_v60 = vld [vmem:[#allocation2 + $0xf8] sm:$0xff]  }
  0x41   : > { %1133 = vmatprep.subr.bf16.mxu0 %v1406_v0  ;;  %v1013_v51 = vld [vmem:[%s1687_s4 + $0x2] ss:$0 sm:$0xff]  ;;  %v1300_v62 = vld [vmem:[%s1686_s3 + $0x8] sm:$0xff]   ;;  %v1301_v63 = vld [vmem:[%s1686_s3 + $0x10] sm:$0xff]   ;;  %p1344_p4 = por %p1343_p3, %p1342_p2 }
  0x42   : > { %v1299_v61 = vld [vmem:[%s1686_s3] sm:$0xff]   ;;  %v1302_v1 = vld [vmem:[%s1686_s3 + $0x18] sm:$0xff]   ;;  %v1304_v3 = vld [vmem:[%s1686_s3 + $0x28] sm:$0xff]  }
  0x43   : > { %1118 = vmatpush3.bf16.msra.mxu1 %v1270_v8  ;;  %v1303_v2 = vld [vmem:[%s1686_s3 + $0x20] sm:$0xff]   ;;  %v1306_v13 = vld [vmem:[%s1686_s3 + $0x38] sm:$0xff]   ;;  %p1345_p7 = pnand %p1344_p4, %p1338_p12 }
  0x44   : > { %1119 = vmatprep.subr.bf16.mxu1 %v1406_v0  ;;  %1134 = vmatpush3.bf16.msra.mxu0 %v1276_v14  ;;  %v1023_v4 = vld [vmem:[%s1687_s4 + $0x3] ss:$0 sm:$0xff]  ;;  %v1033_v14 = vld [vmem:[%s1687_s4 + $0x4] ss:$0 sm:$0xff] }
  0x45   : > { %1135 = vmatprep.subr.bf16.mxu0 %v1406_v0 }
  0x47   : > { %1120 = vmatpush3.bf16.msra.mxu1 %v1271_v9 }
  0x48   : > { %1121 = vmatprep.subr.bf16.mxu1 %v1406_v0  ;;  %1136 = vmatpush3.bf16.msra.mxu0 %v1277_v15 }
  0x49   : > { %1137 = vmatprep.subr.bf16.mxu0 %v1406_v0 }
  0x4b   : > { %1122 = vmatpush3.bf16.msra.mxu1 %v1272_v10 }
  0x4c   : > { %1123 = vmatprep.subr.bf16.mxu1 %v1406_v0  ;;  %1138 = vmatpush3.bf16.msra.mxu0 %v1278_v16 }
  0x4d   : > { %1139 = vmatprep.subr.bf16.mxu0 %v1406_v0 }
  0x4f   : > { %1124 = vmatpush3.bf16.msra.mxu1 %v1273_v11 }
  0x50   : > { %1125 = vmatprep.subr.bf16.mxu1 %v1406_v0  ;;  %1140 = vmatpush3.bf16.msra.mxu0 %v1279_v17 }
  0x51   : > { %1141 = vmatprep.subr.bf16.mxu0 %v1406_v0 }
  0x53   : > { %1126 = vmatpush3.bf16.msra.mxu1 %v1274_v12  ;;  %v1305_v12 = vld [vmem:[%s1686_s3 + $0x30] sm:$0xff]  }
  0x54   : > { %1151 = vmatprep.subr.bf16.mxu1 %v1406_v0  ;;  %1142 = vmatpush3.bf16.msra.mxu0 %v1280_v18 }
  0x55   : > { %1143 = vmatprep.subr.bf16.mxu0 %v1406_v0 }
  0x58   : > { %1144 = vmatpush3.bf16.msra.mxu0 %v1281_v27 }
  0x59   : > { %1145 = vmatprep.subr.bf16.mxu0 %v1406_v0 }
  0x5c   : > { %1146 = vmatpush3.bf16.msra.mxu0 %v1282_v28 }
  0x5d   : > { %1171 = vmatprep.subr.bf16.mxu0 %v1406_v0 }
 0x111   : > { %v326_v20 = vpop.f32.mrb[0].mxu0 }
 0x112   : > { %v327_v21 = vadd.f32 %v998_v19, %v326_v20  ;;  %v1109_v22 = vpop.f32.mrb[1].mxu0 }
 0x113   : > { %v329_v23 = vpop.f32.mrb[2].mxu0 }
 0x114   : > { %v332_v24 = vmax.f32 %v327_v21, 0.0  ;;  %v1110_v25 = vpop.f32.mrb[3].mxu0 }
 0x116   : > { %v333_v26 = vpack.c.bf16 %v332_v24, %v332_v24 }
 0x118   : > { %1128 = vmatmul.mubr.bf16.vlgmr.msra.gmra.mrb[0].mxu1 %v333_v26 }
 0x119   : > { %1167 = vmatprep.mubr.msk.bf16.mxu1 %vm1407_vm0, %v1406_v0  ;;  %1152 = vmatpush3.bf16.msra.mxu1 %v1283_v29 }
 0x11a   : > { %1153 = vmatprep.subr.bf16.mxu1 %v1406_v0 }
 0x11d   : > { %1154 = vmatpush3.bf16.msra.mxu1 %v1284_v30 }
 0x11e   : > { %1155 = vmatprep.subr.bf16.mxu1 %v1406_v0 }
 0x121   : > { %1156 = vmatpush3.bf16.msra.mxu1 %v1285_v31 }
 0x122   : > { %1157 = vmatprep.subr.bf16.mxu1 %v1406_v0 }
 0x125   : > { %1158 = vmatpush3.bf16.msra.mxu1 %v1286_v32 }
 0x126   : > { %1159 = vmatprep.subr.bf16.mxu1 %v1406_v0 }
 0x129   : > { %1160 = vmatpush3.bf16.msra.mxu1 %v1287_v33 }
 0x12a   : > { %1161 = vmatprep.subr.bf16.mxu1 %v1406_v0 }
 0x12d   : > { %1162 = vmatpush3.bf16.msra.mxu1 %v1288_v34 }
 0x12e   : > { %1163 = vmatprep.subr.bf16.mxu1 %v1406_v0 }
 0x131   : > { %1164 = vmatpush3.bf16.msra.mxu1 %v1289_v43 }
 0x132   : > { %1165 = vmatprep.subr.bf16.mxu1 %v1406_v0 }
 0x135   : > { %1166 = vmatpush3.bf16.msra.mxu1 %v1290_v44 }
 0x136   : > { %1191 = vmatprep.subr.bf16.mxu1 %v1406_v0 }
 0x1eb   : > { %v440_v36 = vpop.f32.mrb[0].mxu1 }
 0x1ec   : > { %v441_v37 = vadd.f32 %v1003_v35, %v440_v36  ;;  %v1129_v38 = vpop.f32.mrb[1].mxu1 }
 0x1ed   : > { %v443_v39 = vpop.f32.mrb[2].mxu1 }
 0x1ee   : > { %v446_v40 = vmax.f32 %v441_v37, 0.0  ;;  %v1130_v41 = vpop.f32.mrb[3].mxu1 }
 0x1f0   : > { %v447_v42 = vpack.c.bf16 %v446_v40, %v446_v40 }
 0x1f2   : > { %1148 = vmatmul.mubr.bf16.vlgmr.msra.gmra.mrb[4].mxu0 %v447_v42 }
 0x1f3   : > { %1187 = vmatprep.mubr.msk.bf16.mxu0 %vm1407_vm0, %v1406_v0  ;;  %1172 = vmatpush3.bf16.msra.mxu0 %v1291_v45 }
 0x1f4   : > { %1173 = vmatprep.subr.bf16.mxu0 %v1406_v0 }
 0x1f7   : > { %1174 = vmatpush3.bf16.msra.mxu0 %v1292_v46 }
 0x1f8   : > { %1175 = vmatprep.subr.bf16.mxu0 %v1406_v0 }
 0x1fb   : > { %1176 = vmatpush3.bf16.msra.mxu0 %v1293_v47 }
 0x1fc   : > { %1177 = vmatprep.subr.bf16.mxu0 %v1406_v0 }
 0x1ff   : > { %1178 = vmatpush3.bf16.msra.mxu0 %v1294_v48 }
 0x200   : > { %1179 = vmatprep.subr.bf16.mxu0 %v1406_v0 }
 0x203   : > { %1180 = vmatpush3.bf16.msra.mxu0 %v1295_v49 }
 0x204   : > { %1181 = vmatprep.subr.bf16.mxu0 %v1406_v0 }
 0x207   : > { %1182 = vmatpush3.bf16.msra.mxu0 %v1296_v50 }
 0x208   : > { %1183 = vmatprep.subr.bf16.mxu0 %v1406_v0 }
 0x20b   : > { %1184 = vmatpush3.bf16.msra.mxu0 %v1297_v59 }
 0x20c   : > { %1185 = vmatprep.subr.bf16.mxu0 %v1406_v0 }
 0x20f   : > { %1186 = vmatpush3.bf16.msra.mxu0 %v1298_v60 }
 0x2c5   : > { %v555_v52 = vpop.f32.mrb[4].mxu0 }
 0x2c6   : > { %v556_v53 = vadd.f32 %v1013_v51, %v555_v52  ;;  %v1149_v54 = vpop.f32.mrb[5].mxu0 }
 0x2c7   : > { %v558_v55 = vpop.f32.mrb[6].mxu0 }
 0x2c8   : > { %v561_v56 = vmax.f32 %v556_v53, 0.0  ;;  %v1150_v57 = vpop.f32.mrb[7].mxu0 }
 0x2ca   : > { %v562_v58 = vpack.c.bf16 %v561_v56, %v561_v56 }
 0x2cc   : > { %1168 = vmatmul.mubr.bf16.vlgmr.msra.gmra.mrb[4].mxu1 %v562_v58 }
 0x2cd   : > { %1207 = vmatprep.mubr.msk.bf16.mxu1 %vm1407_vm0, %v1406_v0  ;;  %1192 = vmatpush3.bf16.msra.mxu1 %v1299_v61 }
 0x2ce   : > { %1193 = vmatprep.subr.bf16.mxu1 %v1406_v0 }
 0x2d1   : > { %1194 = vmatpush3.bf16.msra.mxu1 %v1300_v62 }
 0x2d2   : > { %1195 = vmatprep.subr.bf16.mxu1 %v1406_v0 }
 0x2d5   : > { %1196 = vmatpush3.bf16.msra.mxu1 %v1301_v63 }
 0x2d6   : > { %1197 = vmatprep.subr.bf16.mxu1 %v1406_v0 }
 0x2d9   : > { %1198 = vmatpush3.bf16.msra.mxu1 %v1302_v1 }
 0x2da   : > { %1199 = vmatprep.subr.bf16.mxu1 %v1406_v0 }
 0x2dd   : > { %1200 = vmatpush3.bf16.msra.mxu1 %v1303_v2 }
 0x2de   : > { %1201 = vmatprep.subr.bf16.mxu1 %v1406_v0 }
 0x2e1   : > { %1202 = vmatpush3.bf16.msra.mxu1 %v1304_v3 }
 0x2e2   : > { %1203 = vmatprep.subr.bf16.mxu1 %v1406_v0 }
 0x2e5   : > { %1204 = vmatpush3.bf16.msra.mxu1 %v1305_v12 }
 0x2e6   : > { %1205 = vmatprep.subr.bf16.mxu1 %v1406_v0  ;;  %v1042_v0 = vld [vmem:[%s1688_s5] ss:$0 sm:$0xff] }
 0x2e9   : > { %1206 = vmatpush3.bf16.msra.mxu1 %v1306_v13 }
 0x39f   : > { %v670_v5 = vpop.f32.mrb[4].mxu1 }
 0x3a0   : > { %v671_v6 = vadd.f32 %v1023_v4, %v670_v5  ;;  %v1169_v7 = vpop.f32.mrb[5].mxu1 }
 0x3a1   : > { %v673_v8 = vpop.f32.mrb[6].mxu1 }
 0x3a2   : > { %v676_v9 = vmax.f32 %v671_v6, 0.0  ;;  %v1170_v10 = vpop.f32.mrb[7].mxu1 }
 0x3a4   : > { %v677_v11 = vpack.c.bf16 %v676_v9, %v676_v9 }
 0x3a6   : > { %1188 = vmatmul.mubr.bf16.vlgmr.msra.gmra.mrb[8].mxu0 %v677_v11 }
 0x479   : > { %v785_v15 = vpop.f32.mrb[8].mxu0 }
 0x47a   : > { %v786_v16 = vadd.f32 %v1033_v14, %v785_v15  ;;  %v1189_v17 = vpop.f32.mrb[9].mxu0 }
 0x47b   : > { %v788_v18 = vpop.f32.mrb[10].mxu0 }
 0x47c   : > { %v791_v19 = vmax.f32 %v786_v16, 0.0  ;;  %v1190_v20 = vpop.f32.mrb[11].mxu0 }
 0x47e   : > { %v792_v21 = vpack.c.bf16 %v791_v19, %v791_v19 }
 0x480   : > { %1208 = vmatmul.mubr.bf16.vlgmr.msra.gmra.mrb[8].mxu1 %v792_v21 }
 0x553   : > { %v898_v22 = vpop.f32.mrb[8].mxu1 }
 0x554   : > { %v899_v23 = vadd.f32 %v1042_v0, %v898_v22  ;;  %v1209_v24 = vpop.f32.mrb[9].mxu1 }
 0x555   : > { %v901_v25 = vpop.f32.mrb[10].mxu1 }
 0x556   : > { %v1210_v26 = vpop.f32.mrb[11].mxu1  ;;  %904 = vst.msk [vmem:[%s257_s20] sm:$0xff] %vm288_vm1, %v899_v23 }
 0x557   : > { %1348 = shalt.err (!%p1345_p7)
}
 0x558   : > { %s1349_s14 = scalar_lea.hbm %s1640_s10, 128  ;;  %s1353_s17 = scalar_lea.hbm %s1689_s6, 256 }
 0x559   : > { %p1350_p8 = scmp.ne.s32.totalorder %s1640_s10, %s1349_s14  ;;  %p1354_p1 = scmp.lt.u32.totalorder %s1640_s10, %s1689_s6 }
 0x55a   : > { %p1355_p0 = scmp.lt.u32.totalorder %s1353_s17, %s1349_s14  ;;  %p1357_p6 = scmp.lt.u32.totalorder %s1349_s14, %s1640_s10 }
 0x55b   : > { %p1351_p11 = pnand %p1350_p8, %p1700_p9 }
 0x55c   : > { %p1356_p5 = por %p1355_p0, %p1354_p1 }
 0x55d   : > { %p1352_p13 = pneg %p1351_p11 }
 0x55e   : > { %p1358_p10 = por %p1357_p6, %p1356_p5 }
 0x560   : > { %p1359_p12 = pnand %p1358_p10, %p1352_p13 }
 0x562   : > { %1362 = shalt.err (!%p1359_p12)
}
 0x563   : > { %1215 = dma.vmem_to_hbm [thread:$0]  (%p1700_p9), %s1642_s26, 128, %s1640_s10, %s906_s25  }
 0x564 PF: > { %p1227_p2 = scmp.ge.s32.totalorder %s1401_s24, 2  ;;  %s931_s20 = sand.u32 1, %s1389_s21  }
 0x565   : > { %p1701_p3 = scmp.ne.s32.totalorder %s1694_s8, 0  ;;  %s932_s28 = scalar_lea.sflag [#allocation4], %s931_s20 }
 0x567   : > { %p1222_p4 = pnand %p1227_p2, %p1701_p3 }
 0x569   : > { %1384 = dma.done.wait (!%p1222_p4), %s932_s28, 128  }
 0x56a   : > { %1386 = vsyncadd (!%p1222_p4), %s932_s28, 4294967168  ;;  %p17_p7 = scmp.ge.s32.totalorder %s1469_s27, 4   ;;  %s1702_s21 = smov %s1393_s22 }
 0x56b   : > { %s1703_s22 = smov %s1397_s23  ;;  %s1704_s23 = smov %s1480_s30 }
 0x56c   : > { %s1705_s24 = smov %s1469_s27  ;;  %19 = sbr.rel (!%p17_p7) target bundleno = 4 (0x4), region = 91 }
 0x573   :  { %937 = vsyncpa [#allocation3], 1 }
 0x574   :  { %939 = vsyncpa [#allocation3 + $0x1], 1 }
 0x575   :  { %940 = vsyncpa [#allocation4], 1 }
 0x576   :  { %942 = vsyncpa [#allocation4 + $0x1], 1 }

</bundles_post_ra>
